<compile_context>
chip_gen: v5e
topology: v5e:2x2
jax: 0.10.0
libtpu: 0.0.40
codegen_flags: <defaults>
</compile_context>

<pallas_src>
import jax
import jax.numpy as jnp
from jax.experimental import pallas as pl
from jax.experimental.pallas import tpu as pltpu

_LANE = 128
_SUBLANE_PACK = 32               # covers f32 (8) / bf16 (16) / int8,fp8 (32) packing
_TARGET_BLOCK_BYTES = 2 << 20    # ~2 MiB per block
_SINGLE_BLOCK_BYTES = 4 << 20    # ragged arrays up to this size go in one block


def _identity_kernel(x_ref, o_ref):
    # Pure passthrough on the current VMEM tile.
    o_ref[...] = x_ref[...]


def _round_up(v, m):
    return -(-v // m) * m


def _copy_2d(x2d):
    rows, cols = x2d.shape
    itemsize = jnp.dtype(x2d.dtype).itemsize
    row_bytes = max(1, cols * itemsize)

    # Multi-MiB row tile to amortize per-grid-step overhead; rounded to a
    # sublane-pack multiple so packed dtypes stay aligned.
    tile_r = max(_SUBLANE_PACK, _TARGET_BLOCK_BYTES // row_bytes)
    tile_r = _round_up(tile_r, _SUBLANE_PACK)
    if tile_r >= rows:
        tile_r = rows            # block dim == full array dim is always legal
    grid = (pl.cdiv(rows, tile_r),)   # partial tail block is masked by Pallas

    return pl.pallas_call(
        _identity_kernel,
        out_shape=jax.ShapeDtypeStruct((rows, cols), x2d.dtype),
        grid_spec=pltpu.PrefetchScalarGridSpec(
            num_scalar_prefetch=0,
            grid=grid,
            in_specs=[pl.BlockSpec((tile_r, cols), lambda i: (i, 0))],
            out_specs=pl.BlockSpec((tile_r, cols), lambda i: (i, 0)),
        ),
        compiler_params=pltpu.CompilerParams(
            dimension_semantics=("parallel",),
        ),
        cost_estimate=pl.CostEstimate(
            flops=0,
            transcendentals=0,
            bytes_accessed=2 * rows * cols * itemsize,
        ),
    )(x2d)


def identity(x):
    """Identity forward pass: returns a tensor equal to x (same shape/dtype)."""
    orig_shape = x.shape
    n = x.size
    if n == 0:
        return x

    itemsize = jnp.dtype(x.dtype).itemsize

    if n % _LANE == 0:
        # Lane-dense (rows, 128) slab: blocks span the full width, so DMAs are
        # contiguous and stores are unmasked full-width vst.
        x2d = x.reshape(n // _LANE, _LANE)
    elif n * itemsize <= _SINGLE_BLOCK_BYTES:
        # Ragged but small: one full-width (1, n) block; only the final
        # partial vreg is masked (instead of every narrow row).
        x2d = x.reshape(1, n)
    else:
        # Ragged and large: row-split fallback. Last block dim equals the full
        # (un-aligned) last dim, which is legal regardless of 128-divisibility.
        if len(orig_shape) >= 2:
            x2d = x.reshape(-1, orig_shape[-1])
        else:
            x2d = x.reshape(1, -1)

    out2d = _copy_2d(x2d)
    return out2d.reshape(orig_shape)


if __name__ == "__main__":
    key = jax.random.PRNGKey(0)

    # Main case: NCHW activation, numel divisible by 128 -> lane-dense path.
    x = jax.random.normal(key, (2, 4, 16, 16), dtype=jnp.float32)
    y = identity(x)
    jax.block_until_ready(y)
    assert y.shape == x.shape and y.dtype == x.dtype
    assert bool(jnp.array_equal(y, x))

    # Ragged case: numel not divisible by 128 -> single full-width block path.
    x2 = jax.random.normal(jax.random.PRNGKey(1), (3, 5, 7), dtype=jnp.float32)
    y2 = identity(x2)
    jax.block_until_ready(y2)
    assert y2.shape == x2.shape and y2.dtype == x2.dtype
    assert bool(jnp.array_equal(y2, x2))

    print("KERNEL_OK")
</pallas_src>

<mosaic_0001>
module attributes {stable_mosaic.version = 11 : i64} {
  func.func @_identity_kernel(%arg0: i32, %arg1: memref<16x128xf32, #tpu.memory_space<vmem>>, %arg2: memref<16x128xf32, #tpu.memory_space<vmem>>) attributes {dimension_semantics = [#tpu.dimension_semantics<parallel>], iteration_bounds = array<i64: 1>, scalar_prefetch = 0 : i64, scratch_operands = 0 : i64, tpu.core_type = #tpu.core_type<tc>, window_params = [{transform_indices = @transform_0, window_bounds = array<i64: 16, 128>}, {transform_indices = @transform_1, window_bounds = array<i64: 16, 128>}]} {
    %c0 = arith.constant 0 : index
    %c0_0 = arith.constant 0 : index
    %0 = vector.load %arg1[%c0, %c0_0] : memref<16x128xf32, #tpu.memory_space<vmem>>, vector<16x128xf32>
    %c0_1 = arith.constant 0 : index
    %c0_2 = arith.constant 0 : index
    %1 = vector.load %arg2[%c0_1, %c0_2] : memref<16x128xf32, #tpu.memory_space<vmem>>, vector<16x128xf32>
    tpu.vector_store %arg2[%c0_1, %c0_2], %0 {strides = array<i32>} : memref<16x128xf32, #tpu.memory_space<vmem>>, vector<16x128xf32>,
    return
  }
  func.func @transform_0(%arg0: i32) -> (i32, i32) {
    %c0_i32 = arith.constant 0 : i32
    %c0_i32_0 = arith.constant 0 : i32
    return %arg0, %c0_i32 : i32, i32
  }
  func.func @transform_1(%arg0: i32) -> (i32, i32) {
    %c0_i32 = arith.constant 0 : i32
    %c0_i32_0 = arith.constant 0 : i32
    return %arg0, %c0_i32 : i32, i32
  }
}

</mosaic_0001>

<bundles_post_ra>
// kernel: tpu_custom_call.1
= control target key start
LH: loop header
LB: loop body
LE: loop exit
PB: predicated region body
PF: predicated region fallthrough
CT: control target
= control target key end

     0   :  { %6 = vsyncpa [#allocation3], 0  ;;  %s124_s0 = inlined_call_operand.hbm [shape: f32[16,128], index: 0, kind: input, shape index: {}]   ;;  %s125_s1 = inlined_call_operand.hbm [shape: f32[16,128], index: 1, kind: output, shape index: {}]  }
   0x1   :  { %7 = vsyncpa [#allocation4], 0  ;;  %s12_s8 = sshll.u32 %s124_s0, 4  ;;  %s104_s9 = smov [#allocation2]   ;;  %s13_s8 = int_to_ptr.hbm [resolvable:$true] %s12_s8 }
   0x2   :  { %s14_s10 = sshll.u32 %s104_s9, 4  ;;  %s105_s11 = smov 128   ;;  %s15_s10 = int_to_ptr.vmem [resolvable:$true] %s14_s10 }
   0x3   :  { %s106_s12 = smov 8  }
   0x4   :  { %20 = dma.hbm_to_vmem [thread:$0]  %s13_s8, 256, %s15_s10, [#allocation3], %s105_s11, %s105_s11, %s106_s12  }
   0x5   :  { %100 = dma.done.wait [#allocation3], 256  }
   0x6   :  { %101 = vsyncadd [#allocation3], 4294967040  ;;  %s107_s13 = smov [#allocation5]   ;;  %s35_s17 = sshll.u32 %s125_s1, 4  ;;  %v25_v0 = vld [vmem:[#allocation2] sm:$0xff]  ;;  %v26_v1 = vld [vmem:[#allocation2 + $0x8] sm:$0xff]  ;;  %s36_s17 = int_to_ptr.hbm [resolvable:$true] %s35_s17 }
   0x7   :  { %s33_s14 = sshll.u32 %s107_s13, 4  ;;  %27 = vst [vmem:[#allocation5] sm:$0xff] %v25_v0  ;;  %s34_s14 = int_to_ptr.vmem [resolvable:$true] %s33_s14 }
   0x8   :  { %28 = vst [vmem:[#allocation5 + $0x8] sm:$0xff] %v26_v1 }
   0x9   :  { %41 = dma.vmem_to_hbm [thread:$0]  %s34_s14, 256, %s36_s17, [#allocation4], %s105_s11, %s105_s11, %s106_s12  }
   0xa   :  { %102 = dma.done.wait [#allocation4], 256  }
   0xb   :  { %103 = vsyncadd [#allocation4], 4294967040 }
   0xc   :  { %46 = vsyncpa [#allocation3], 1 }
   0xd   :  { %47 = vsyncpa [#allocation4], 1 }

</bundles_post_ra>
